<compile_context>
chip_gen: v7x
topology: tpu7x:2x2x1
jax: 0.10.0
libtpu: 0.0.40
codegen_flags: <defaults>
</compile_context>

<pallas_src>
import functools

import jax
import jax.numpy as jnp
from jax.experimental import pallas as pl
from jax.experimental.pallas import tpu as pltpu


def _cost_volume_kernel(x_ref, y_ref, cost_ref, *, num_channels, td):
    """One (batch, h-tile, disparity-block) grid step.

    x_ref, y_ref : (C, tile_h, W)        left / right feature tiles
    cost_ref     : (2C, td, tile_h, W)   output slab for disparities
                                         [program_id(2)*td, program_id(2)*td + td)
    """
    d0 = pl.program_id(2) * td

    x = x_ref[...]
    y = y_ref[...]
    zero = jnp.zeros((), x.dtype)

    # Lane-index iota, built once and broadcast inside the selects below
    # (JAX does not CSE broadcast_in_dim, so keep it tiny and hoisted).
    w_idx = jax.lax.broadcasted_iota(jnp.int32, (1, 1, x.shape[-1]), 2)

    for dd in range(td):  # static unroll over the disparity block
        d = d0 + dd
        valid = w_idx >= d  # output column w is populated only for w >= d

        # Left features: pass-through with columns w < d zeroed.
        cost_ref[:num_channels, dd] = jnp.where(valid, x, zero)

        # Right features shifted right by d along W: y_shift[..., w] = y[..., w-d];
        # the wrapped-around lanes (w < d) are zeroed by the same mask.
        y_shift = pltpu.roll(y, shift=d, axis=2)
        cost_ref[num_channels:, dd] = jnp.where(valid, y_shift, zero)


def _vmem_capacity_bytes():
    """Physical VMEM of the local chip (64 MiB on v7x, 128 MiB on v5e/v6e)."""
    try:
        info = pltpu.get_tpu_info()
        for attr in ("vmem_capacity_bytes", "vmem_size_bytes", "vmem_bytes"):
            val = getattr(info, attr, None)
            if val:
                return int(val)
    except Exception:
        pass
    return 64 * 1024 * 1024  # conservative default (v7x per-core VMEM)


def _divisors_desc(n):
    return [d for d in range(n, 0, -1) if n % d == 0]


def _choose_tiling(C, H, W, D, itemsize, sub, budget_bytes, max_td=8):
    """Pick (tile_h, td) maximizing the per-step output slab within the budget."""
    h_cands = [h for h in _divisors_desc(H) if h % sub == 0] or [H]
    td_cands = [t for t in _divisors_desc(D) if t <= max_td] or [1]

    def working_set(th, td):
        inp = 2 * C * th * W * itemsize        # x tile + y tile (revisited over d)
        out = 2 * C * td * th * W * itemsize   # td-disparity output slab
        return 2 * (inp + out)                 # double-buffered pipeline

    best = None
    for td in td_cands:
        for th in h_cands:
            if working_set(th, td) <= budget_bytes:
                key = (th * td, th)            # slab size; tie-break: bigger h tile
                if best is None or key > best[0]:
                    best = (key, th, td)
    if best is None:                           # nothing fits: smallest legal tiles
        return h_cands[-1], td_cands[-1]
    return best[1], best[2]


def _ensure_megacore_occupancy(B, H, D, th, td, sub):
    """Make sure the (all-parallel) grid has >= 2 steps so both v7x TCs work."""
    if B * (H // th) * (D // td) >= 2:
        return th, td
    # Prefer splitting the disparity axis: input-tile revisiting is unaffected.
    for t in _divisors_desc(D):
        if t < td:
            return th, t
    for h in _divisors_desc(H):
        if h < th and h % sub == 0:
            return h, td
    return th, td


def get_cost_volume(x, y, maxdisp):
    """Pallas equivalent of GetCostVolume(maxdisp).forward(x, y).

    x, y: [B, C, H, W]  ->  cost volume [B, 2*C, maxdisp + 1, H, W] (dtype of x).
    """
    assert x.shape == y.shape and x.dtype == y.dtype
    B, C, H, W = x.shape
    D = maxdisp + 1  # the module stores maxdisp + 1 disparity bins
    itemsize = jnp.dtype(x.dtype).itemsize

    # Dtype-aware sublane tile: 8 rows for f32, 16 for bf16, 32 for int8/fp8.
    sub = max(8, 32 // itemsize)

    # VMEM budget / scoped limit derived per chip generation.
    cap = _vmem_capacity_bytes()
    budget = min(cap // 2, 64 * 1024 * 1024)

    tile_h, td = _choose_tiling(C, H, W, D, itemsize, sub, budget)
    tile_h, td = _ensure_megacore_occupancy(B, H, D, tile_h, td, sub)

    est = 2 * (2 * C * tile_h * W + 2 * C * td * tile_h * W) * itemsize
    vmem_limit = min(max(budget + (16 << 20), est + (8 << 20)), (cap * 9) // 10)
    vmem_limit = int(max(vmem_limit, 32 << 20))

    grid = (B, H // tile_h, D // td)  # d innermost -> x/y tiles reused across it

    kernel = functools.partial(_cost_volume_kernel, num_channels=C, td=td)

    # Advisory cost for XLA's scheduler: this call is a big HBM-bandwidth consumer.
    bytes_accessed = (2 * B * C * H * W + B * 2 * C * D * H * W) * itemsize
    cost = pl.CostEstimate(flops=0, transcendentals=0, bytes_accessed=bytes_accessed)

    # NOTE: if W % 128 != 0 the tail output stores are lane-masked; padding W to a
    # multiple of 128 and slicing afterwards would double output HBM traffic (the
    # cost volume is 2C*D x larger than the inputs), so masked tails are accepted.
    return pl.pallas_call(
        kernel,
        out_shape=jax.ShapeDtypeStruct((B, 2 * C, D, H, W), x.dtype),
        grid_spec=pltpu.PrefetchScalarGridSpec(
            num_scalar_prefetch=0,
            grid=grid,
            in_specs=[
                pl.BlockSpec((None, C, tile_h, W), lambda b, h, d: (b, 0, h, 0)),
                pl.BlockSpec((None, C, tile_h, W), lambda b, h, d: (b, 0, h, 0)),
            ],
            out_specs=pl.BlockSpec(
                (None, 2 * C, td, tile_h, W), lambda b, h, d: (b, 0, d, h, 0)
            ),
        ),
        compiler_params=pltpu.CompilerParams(
            # Every grid step writes a disjoint output block (no accumulation),
            # so all axes are parallel -> v7x megacore may shard any of them.
            dimension_semantics=("parallel", "parallel", "parallel"),
            vmem_limit_bytes=vmem_limit,
        ),
        cost_estimate=cost,
    )(x, y)


def _reference(x, y, maxdisp):
    """Direct transcription of the PyTorch forward."""
    B, C, H, W = x.shape
    D = maxdisp + 1
    cost = jnp.zeros((B, 2 * C, D, H, W), x.dtype)
    for i in range(D):
        if i > 0:
            cost = cost.at[:, :C, i, :, i:].set(x[:, :, :, i:])
            cost = cost.at[:, C:, i, :, i:].set(y[:, :, :, :-i])
        else:
            cost = cost.at[:, :C, i, :, :].set(x)
            cost = cost.at[:, C:, i, :, :].set(y)
    return cost


if __name__ == "__main__":
    key = jax.random.PRNGKey(0)
    kx, ky = jax.random.split(key)

    # Small but lane-dense shapes (W multiple of 128 keeps output stores unmasked).
    B, C, H, W = 2, 4, 16, 128
    maxdisp = 3  # module builds maxdisp + 1 = 4 disparity bins

    x = jax.random.normal(kx, (B, C, H, W), dtype=jnp.float32)
    y = jax.random.normal(ky, (B, C, H, W), dtype=jnp.float32)

    out = jax.block_until_ready(get_cost_volume(x, y, maxdisp))

    ref = _reference(x, y, maxdisp)
    assert out.shape == (B, 2 * C, maxdisp + 1, H, W)
    assert jnp.array_equal(out, ref)

    print("KERNEL_OK")
</pallas_src>

<mosaic_0001>
module attributes {stable_mosaic.version = 11 : i64} {
  func.func @_cost_volume_kernel(%arg0: i32, %arg1: i32, %arg2: i32, %arg3: memref<1x4x16x128xf32, #tpu.memory_space<vmem>>, %arg4: memref<1x4x16x128xf32, #tpu.memory_space<vmem>>, %arg5: memref<1x8x4x16x128xf32, #tpu.memory_space<vmem>>) attributes {dimension_semantics = [#tpu.dimension_semantics<parallel>, #tpu.dimension_semantics<parallel>, #tpu.dimension_semantics<parallel>], iteration_bounds = array<i64: 2, 1, 1>, scalar_prefetch = 0 : i64, scratch_operands = 0 : i64, tpu.core_type = #tpu.core_type<tc>, window_params = [{transform_indices = @transform_0, window_bounds = array<i64: 1, 4, 16, 128>}, {transform_indices = @transform_1, window_bounds = array<i64: 1, 4, 16, 128>}, {transform_indices = @transform_2, window_bounds = array<i64: 1, 8, 4, 16, 128>}]} {
    %c4_i32 = arith.constant 4 : i32
    %0 = arith.muli %arg2, %c4_i32 : i32
    %c0 = arith.constant 0 : index
    %c0_0 = arith.constant 0 : index
    %c0_1 = arith.constant 0 : index
    %c0_2 = arith.constant 0 : index
    %1 = vector.load %arg3[%c0, %c0_0, %c0_1, %c0_2] : memref<1x4x16x128xf32, #tpu.memory_space<vmem>>, vector<1x4x16x128xf32>
    %2 = vector.shape_cast %1 : vector<1x4x16x128xf32> to vector<4x16x128xf32>
    %c0_3 = arith.constant 0 : index
    %c0_4 = arith.constant 0 : index
    %c0_5 = arith.constant 0 : index
    %c0_6 = arith.constant 0 : index
    %3 = vector.load %arg4[%c0_3, %c0_4, %c0_5, %c0_6] : memref<1x4x16x128xf32, #tpu.memory_space<vmem>>, vector<1x4x16x128xf32>
    %4 = vector.shape_cast %3 : vector<1x4x16x128xf32> to vector<4x16x128xf32>
    %5 = tpu.iota {dimensions = array<i32: 2>} : vector<1x1x128xi32>
    %c0_i32 = arith.constant 0 : i32
    %6 = arith.addi %0, %c0_i32 : i32
    %7 = vector.broadcast %6 : i32 to vector<1x1x128xi32>
    %8 = arith.cmpi sge, %5, %7 : vector<1x1x128xi32>
    %cst = arith.constant 0.000000e+00 : f32
    %9 = vector.shape_cast %8 : vector<1x1x128xi1> to vector<1x1x128xi1>
    %10 = vector.broadcast %9 : vector<1x1x128xi1> to vector<4x16x128xi1>
    %11 = vector.broadcast %cst : f32 to vector<4x16x128xf32>
    %12 = arith.select %10, %2, %11 : vector<4x16x128xi1>, vector<4x16x128xf32>
    %c0_7 = arith.constant 0 : index
    %c0_8 = arith.constant 0 : index
    %c0_9 = arith.constant 0 : index
    %c0_10 = arith.constant 0 : index
    %c0_11 = arith.constant 0 : index
    %13 = vector.load %arg5[%c0_7, %c0_8, %c0_9, %c0_10, %c0_11] : memref<1x8x4x16x128xf32, #tpu.memory_space<vmem>>, vector<1x4x1x16x128xf32>
    %14 = vector.shape_cast %13 : vector<1x4x1x16x128xf32> to vector<4x16x128xf32>
    %15 = vector.shape_cast %12 : vector<4x16x128xf32> to vector<1x4x1x16x128xf32>
    tpu.vector_store %arg5[%c0_7, %c0_8, %c0_9, %c0_10, %c0_11], %15 {strides = array<i32>} : memref<1x8x4x16x128xf32, #tpu.memory_space<vmem>>, vector<1x4x1x16x128xf32>,
    %16 = tpu.dynamic_rotate %4 by %6 dim 2 : vector<4x16x128xf32>, i32 -> vector<4x16x128xf32>
    %cst_12 = arith.constant 0.000000e+00 : f32
    %17 = vector.shape_cast %8 : vector<1x1x128xi1> to vector<1x1x128xi1>
    %18 = vector.broadcast %17 : vector<1x1x128xi1> to vector<4x16x128xi1>
    %19 = vector.broadcast %cst_12 : f32 to vector<4x16x128xf32>
    %20 = arith.select %18, %16, %19 : vector<4x16x128xi1>, vector<4x16x128xf32>
    %c0_13 = arith.constant 0 : index
    %c4 = arith.constant 4 : index
    %c0_14 = arith.constant 0 : index
    %c0_15 = arith.constant 0 : index
    %c0_16 = arith.constant 0 : index
    %21 = vector.load %arg5[%c0_13, %c4, %c0_14, %c0_15, %c0_16] : memref<1x8x4x16x128xf32, #tpu.memory_space<vmem>>, vector<1x4x1x16x128xf32>
    %22 = vector.shape_cast %21 : vector<1x4x1x16x128xf32> to vector<4x16x128xf32>
    %23 = vector.shape_cast %20 : vector<4x16x128xf32> to vector<1x4x1x16x128xf32>
    tpu.vector_store %arg5[%c0_13, %c4, %c0_14, %c0_15, %c0_16], %23 {strides = array<i32>} : memref<1x8x4x16x128xf32, #tpu.memory_space<vmem>>, vector<1x4x1x16x128xf32>,
    %c1_i32 = arith.constant 1 : i32
    %24 = arith.addi %0, %c1_i32 : i32
    %25 = vector.broadcast %24 : i32 to vector<1x1x128xi32>
    %26 = arith.cmpi sge, %5, %25 : vector<1x1x128xi32>
    %cst_17 = arith.constant 0.000000e+00 : f32
    %27 = vector.shape_cast %26 : vector<1x1x128xi1> to vector<1x1x128xi1>
    %28 = vector.broadcast %27 : vector<1x1x128xi1> to vector<4x16x128xi1>
    %29 = vector.broadcast %cst_17 : f32 to vector<4x16x128xf32>
    %30 = arith.select %28, %2, %29 : vector<4x16x128xi1>, vector<4x16x128xf32>
    %c0_18 = arith.constant 0 : index
    %c0_19 = arith.constant 0 : index
    %c1 = arith.constant 1 : index
    %c0_20 = arith.constant 0 : index
    %c0_21 = arith.constant 0 : index
    %31 = vector.load %arg5[%c0_18, %c0_19, %c1, %c0_20, %c0_21] : memref<1x8x4x16x128xf32, #tpu.memory_space<vmem>>, vector<1x4x1x16x128xf32>
    %32 = vector.shape_cast %31 : vector<1x4x1x16x128xf32> to vector<4x16x128xf32>
    %33 = vector.shape_cast %30 : vector<4x16x128xf32> to vector<1x4x1x16x128xf32>
    tpu.vector_store %arg5[%c0_18, %c0_19, %c1, %c0_20, %c0_21], %33 {strides = array<i32>} : memref<1x8x4x16x128xf32, #tpu.memory_space<vmem>>, vector<1x4x1x16x128xf32>,
    %34 = tpu.dynamic_rotate %4 by %24 dim 2 : vector<4x16x128xf32>, i32 -> vector<4x16x128xf32>
    %cst_22 = arith.constant 0.000000e+00 : f32
    %35 = vector.shape_cast %26 : vector<1x1x128xi1> to vector<1x1x128xi1>
    %36 = vector.broadcast %35 : vector<1x1x128xi1> to vector<4x16x128xi1>
    %37 = vector.broadcast %cst_22 : f32 to vector<4x16x128xf32>
    %38 = arith.select %36, %34, %37 : vector<4x16x128xi1>, vector<4x16x128xf32>
    %c0_23 = arith.constant 0 : index
    %c4_24 = arith.constant 4 : index
    %c1_25 = arith.constant 1 : index
    %c0_26 = arith.constant 0 : index
    %c0_27 = arith.constant 0 : index
    %39 = vector.load %arg5[%c0_23, %c4_24, %c1_25, %c0_26, %c0_27] : memref<1x8x4x16x128xf32, #tpu.memory_space<vmem>>, vector<1x4x1x16x128xf32>
    %40 = vector.shape_cast %39 : vector<1x4x1x16x128xf32> to vector<4x16x128xf32>
    %41 = vector.shape_cast %38 : vector<4x16x128xf32> to vector<1x4x1x16x128xf32>
    tpu.vector_store %arg5[%c0_23, %c4_24, %c1_25, %c0_26, %c0_27], %41 {strides = array<i32>} : memref<1x8x4x16x128xf32, #tpu.memory_space<vmem>>, vector<1x4x1x16x128xf32>,
    %c2_i32 = arith.constant 2 : i32
    %42 = arith.addi %0, %c2_i32 : i32
    %43 = vector.broadcast %42 : i32 to vector<1x1x128xi32>
    %44 = arith.cmpi sge, %5, %43 : vector<1x1x128xi32>
    %cst_28 = arith.constant 0.000000e+00 : f32
    %45 = vector.shape_cast %44 : vector<1x1x128xi1> to vector<1x1x128xi1>
    %46 = vector.broadcast %45 : vector<1x1x128xi1> to vector<4x16x128xi1>
    %47 = vector.broadcast %cst_28 : f32 to vector<4x16x128xf32>
    %48 = arith.select %46, %2, %47 : vector<4x16x128xi1>, vector<4x16x128xf32>
    %c0_29 = arith.constant 0 : index
    %c0_30 = arith.constant 0 : index
    %c2 = arith.constant 2 : index
    %c0_31 = arith.constant 0 : index
    %c0_32 = arith.constant 0 : index
    %49 = vector.load %arg5[%c0_29, %c0_30, %c2, %c0_31, %c0_32] : memref<1x8x4x16x128xf32, #tpu.memory_space<vmem>>, vector<1x4x1x16x128xf32>
    %50 = vector.shape_cast %49 : vector<1x4x1x16x128xf32> to vector<4x16x128xf32>
    %51 = vector.shape_cast %48 : vector<4x16x128xf32> to vector<1x4x1x16x128xf32>
    tpu.vector_store %arg5[%c0_29, %c0_30, %c2, %c0_31, %c0_32], %51 {strides = array<i32>} : memref<1x8x4x16x128xf32, #tpu.memory_space<vmem>>, vector<1x4x1x16x128xf32>,
    %52 = tpu.dynamic_rotate %4 by %42 dim 2 : vector<4x16x128xf32>, i32 -> vector<4x16x128xf32>
    %cst_33 = arith.constant 0.000000e+00 : f32
    %53 = vector.shape_cast %44 : vector<1x1x128xi1> to vector<1x1x128xi1>
    %54 = vector.broadcast %53 : vector<1x1x128xi1> to vector<4x16x128xi1>
    %55 = vector.broadcast %cst_33 : f32 to vector<4x16x128xf32>
    %56 = arith.select %54, %52, %55 : vector<4x16x128xi1>, vector<4x16x128xf32>
    %c0_34 = arith.constant 0 : index
    %c4_35 = arith.constant 4 : index
    %c2_36 = arith.constant 2 : index
    %c0_37 = arith.constant 0 : index
    %c0_38 = arith.constant 0 : index
    %57 = vector.load %arg5[%c0_34, %c4_35, %c2_36, %c0_37, %c0_38] : memref<1x8x4x16x128xf32, #tpu.memory_space<vmem>>, vector<1x4x1x16x128xf32>
    %58 = vector.shape_cast %57 : vector<1x4x1x16x128xf32> to vector<4x16x128xf32>
    %59 = vector.shape_cast %56 : vector<4x16x128xf32> to vector<1x4x1x16x128xf32>
    tpu.vector_store %arg5[%c0_34, %c4_35, %c2_36, %c0_37, %c0_38], %59 {strides = array<i32>} : memref<1x8x4x16x128xf32, #tpu.memory_space<vmem>>, vector<1x4x1x16x128xf32>,
    %c3_i32 = arith.constant 3 : i32
    %60 = arith.addi %0, %c3_i32 : i32
    %61 = vector.broadcast %60 : i32 to vector<1x1x128xi32>
    %62 = arith.cmpi sge, %5, %61 : vector<1x1x128xi32>
    %cst_39 = arith.constant 0.000000e+00 : f32
    %63 = vector.shape_cast %62 : vector<1x1x128xi1> to vector<1x1x128xi1>
    %64 = vector.broadcast %63 : vector<1x1x128xi1> to vector<4x16x128xi1>
    %65 = vector.broadcast %cst_39 : f32 to vector<4x16x128xf32>
    %66 = arith.select %64, %2, %65 : vector<4x16x128xi1>, vector<4x16x128xf32>
    %c0_40 = arith.constant 0 : index
    %c0_41 = arith.constant 0 : index
    %c3 = arith.constant 3 : index
    %c0_42 = arith.constant 0 : index
    %c0_43 = arith.constant 0 : index
    %67 = vector.load %arg5[%c0_40, %c0_41, %c3, %c0_42, %c0_43] : memref<1x8x4x16x128xf32, #tpu.memory_space<vmem>>, vector<1x4x1x16x128xf32>
    %68 = vector.shape_cast %67 : vector<1x4x1x16x128xf32> to vector<4x16x128xf32>
    %69 = vector.shape_cast %66 : vector<4x16x128xf32> to vector<1x4x1x16x128xf32>
    tpu.vector_store %arg5[%c0_40, %c0_41, %c3, %c0_42, %c0_43], %69 {strides = array<i32>} : memref<1x8x4x16x128xf32, #tpu.memory_space<vmem>>, vector<1x4x1x16x128xf32>,
    %70 = tpu.dynamic_rotate %4 by %60 dim 2 : vector<4x16x128xf32>, i32 -> vector<4x16x128xf32>
    %cst_44 = arith.constant 0.000000e+00 : f32
    %71 = vector.shape_cast %62 : vector<1x1x128xi1> to vector<1x1x128xi1>
    %72 = vector.broadcast %71 : vector<1x1x128xi1> to vector<4x16x128xi1>
    %73 = vector.broadcast %cst_44 : f32 to vector<4x16x128xf32>
    %74 = arith.select %72, %70, %73 : vector<4x16x128xi1>, vector<4x16x128xf32>
    %c0_45 = arith.constant 0 : index
    %c4_46 = arith.constant 4 : index
    %c3_47 = arith.constant 3 : index
    %c0_48 = arith.constant 0 : index
    %c0_49 = arith.constant 0 : index
    %75 = vector.load %arg5[%c0_45, %c4_46, %c3_47, %c0_48, %c0_49] : memref<1x8x4x16x128xf32, #tpu.memory_space<vmem>>, vector<1x4x1x16x128xf32>
    %76 = vector.shape_cast %75 : vector<1x4x1x16x128xf32> to vector<4x16x128xf32>
    %77 = vector.shape_cast %74 : vector<4x16x128xf32> to vector<1x4x1x16x128xf32>
    tpu.vector_store %arg5[%c0_45, %c4_46, %c3_47, %c0_48, %c0_49], %77 {strides = array<i32>} : memref<1x8x4x16x128xf32, #tpu.memory_space<vmem>>, vector<1x4x1x16x128xf32>,
    return
  }
  func.func @transform_0(%arg0: i32, %arg1: i32, %arg2: i32) -> (i32, i32, i32, i32) {
    %c0_i32 = arith.constant 0 : i32
    %c0_i32_0 = arith.constant 0 : i32
    %c0_i32_1 = arith.constant 0 : i32
    return %arg0, %c0_i32, %arg1, %c0_i32_0 : i32, i32, i32, i32
  }
  func.func @transform_1(%arg0: i32, %arg1: i32, %arg2: i32) -> (i32, i32, i32, i32) {
    %c0_i32 = arith.constant 0 : i32
    %c0_i32_0 = arith.constant 0 : i32
    %c0_i32_1 = arith.constant 0 : i32
    return %arg0, %c0_i32, %arg1, %c0_i32_0 : i32, i32, i32, i32
  }
  func.func @transform_2(%arg0: i32, %arg1: i32, %arg2: i32) -> (i32, i32, i32, i32, i32) {
    %c0_i32 = arith.constant 0 : i32
    %c0_i32_0 = arith.constant 0 : i32
    %c0_i32_1 = arith.constant 0 : i32
    return %arg0, %c0_i32, %arg2, %arg1, %c0_i32_0 : i32, i32, i32, i32, i32
  }
}

</mosaic_0001>

<bundles_post_ra>
// kernel: tpu_custom_call.1
= control target key start
LH: loop header
LB: loop body
LE: loop exit
PB: predicated region body
PF: predicated region fallthrough
CT: control target
= control target key end

     0   :  { %7 = vsyncpa [#allocation3], 0  ;;  %s1415_s0 = inlined_call_operand.hbm [shape: f32[2,4,16,128], index: 0, kind: input, shape index: {}]   ;;  %s1416_s1 = inlined_call_operand.hbm [shape: f32[2,4,16,128], index: 1, kind: input, shape index: {}]   ;;  %s1417_s2 = inlined_call_operand.hbm [shape: f32[2,8,4,16,128], index: 2, kind: output, shape index: {}]  }
   0x1   :  { %9 = vsyncpa [#allocation3 + $0x1], 0 }
   0x2   :  { %10 = vsyncpa [#allocation6], 0 }
   0x3   :  { %12 = vsyncpa [#allocation6 + $0x1], 0 }
   0x4   :  { %13 = vsyncpa [#allocation4], 0 }
   0x5   :  { %15 = vsyncpa [#allocation4 + $0x1], 0  ;;  %s944_s9 = smov 0   ;;  %s946_s10 = smov 0  }
   0x6   :  { %s948_s11 = smov 0   ;;  %s950_s12 = smov 0  }
   0x7   :  { %s952_s13 = smov 0   ;;  %s954_s14 = smov 0  }
   0x8 LB: > { %s619_s15 = sadd.s32 4294967295, %s917_s14   ;;  %s620_s16 = sadd.s32 4294967294, %s917_s14   ;;  %s917_s14 = sphi %s954_s14, %s21_s14   ;;  %s913_s13 = sphi %s952_s13, %s1435_s13   ;;  %s909_s12 = sphi %s950_s12, %s1434_s12   ;;  %s905_s11 = sphi %s948_s11, %s1433_s11   ;;  %s901_s10 = sphi %s946_s10, %s1432_s10   ;;  %s897_s9 = sphi %s944_s9, %s1431_s9  }
   0x9   : > { %s40_s17 = sadd.s32 1, %s913_s13  ;;  %s49_s18 = sadd.s32 1, %s905_s11 }
   0xa   : > { %p42_p0 = scmp.ge.s32.totalorder %s40_s17, 2  ;;  %p56_p1 = scmp.ne.s32.totalorder %s905_s11, %s901_s10 }
   0xb   : > { %p57_p2 = scmp.eq.s32.totalorder %s917_s14, 0  ;;  %p62_p3 = scmp.ne.s32.totalorder %s901_s10, %s897_s9 }
   0xc   : > { %s1437_s17 = smov (%p42_p0, %s40_s17), 0  ;;  %p63_p5 = scmp.eq.s32.totalorder %s619_s15, 0 }
   0xd   : > { %p985_p4 = por %p57_p2, %p56_p1  ;;  %s44_s20 = ssub.s32 %s913_s13, %s1437_s17 }
   0xe   : > { %p118_p6 = scmp.eq.s32.totalorder %s619_s15, 1  ;;  %p47_p7 = scmp.eq.s32.totalorder %s44_s20, 0 }
   0xf   : > { %p991_p8 = por %p63_p5, %p62_p3  ;;  %p124_p10 = scmp.eq.s32.totalorder %s620_s16, 1 }
  0x10   : > { %p995_p9 = por %p118_p6, %p56_p1  ;;  %p714_p13 = scmp.lt.s32.totalorder %s917_s14, 2 }
  0x11   : > { %s1421_s21 = scalar_select %p991_p8, 1, 0 }
  0x12   : > { %s1422_s22 = scalar_select %p995_p9, 1, 0 }
  0x13   : > { %s1000_s23 = scalar_select %p47_p7, %s905_s11, %s49_s18  }
  0x14   : > { %p1002_p11 = por %p124_p10, %p62_p3  ;;  %s1009_s25 = sand.u32 1, %s905_s11  }
  0x15   : > { %s623_s26 = sshll.u32 %s1009_s25, 6  ;;  %s694_s27 = sshll.u32 %s913_s13, 10 }
  0x16   : > { %s1423_s24 = scalar_select %p1002_p11, 1, 0 }
  0x17   : > { %s1018_s30 = scalar_lea.hbm %s1415_s0, %s694_s27  ;;  %s148_s3 = scalar_lea.vmem [#allocation2], %s623_s26 }
  0x18   : > { %s157_s4 = sshll.u32 %s148_s3, 4  ;;  %p1026_p0 = pnand %p714_p13, %p985_p4  ;;  %s1022_s4 = int_to_ptr.vmem [resolvable:$true] %s157_s4 }
  0x19   : > { %s145_s6 = scalar_lea.sflag [#allocation3], %s1009_s25  ;;  %s771_s7 = scalar_lea.hbm %s1018_s30, 1024 }
  0x1a   : > { %p772_p2 = scmp.ne.s32.totalorder %s1018_s30, %s771_s7  ;;  %p773_p3 = pneg %p1026_p0 }
  0x1b   : > { %s776_s16 = scalar_lea.hbm %s1415_s0, 2048  ;;  %p777_p4 = scmp.lt.u32.totalorder %s1018_s30, %s1415_s0 }
  0x1c   : > { %p774_p5 = pnand %p773_p3, %p772_p2  ;;  %p778_p7 = scmp.lt.u32.totalorder %s776_s16, %s771_s7 }
  0x1d   : > { %p780_p13 = scmp.lt.u32.totalorder %s771_s7, %s1018_s30 }
  0x1e   : > { %p775_p6 = pneg %p774_p5  ;;  %p779_p10 = por %p778_p7, %p777_p4 }
  0x20   : > { %p781_p12 = por %p780_p13, %p779_p10 }
  0x22   : > { %p782_p1 = pnand %p781_p12, %p775_p6 }
  0x24   : > { %785 = shalt.err (!%p782_p1)
}
  0x25   : > { %s786_s20 = scalar_lea.vmem %s1022_s4, 1024  ;;  %s919_s28 = smov [#allocation2]  }
  0x26   : > { %p787_p2 = scmp.ne.s32.totalorder %s1022_s4, %s786_s20  ;;  %s791_s29 = sshll.u32 %s919_s28, 4  ;;  %s792_s29 = int_to_ptr.vmem [resolvable:$false] %s791_s29 }
  0x27   : > { %s793_s3 = scalar_lea.vmem %s792_s29, 2048  ;;  %p794_p9 = scmp.lt.s32.totalorder %s1022_s4, %s792_s29 }
  0x28   : > { %p789_p5 = pnand %p787_p2, %p773_p3  ;;  %p795_p4 = scmp.lt.s32.totalorder %s793_s3, %s786_s20 }
  0x2a   : > { %p790_p11 = pneg %p789_p5  ;;  %p796_p7 = por %p795_p4, %p794_p9 }
  0x2c   : > { %p797_p10 = pnand %p796_p7, %p790_p11 }
  0x2e   : > { %800 = shalt.err (!%p797_p10)
}
  0x2f   : > { %s920_s7 = smov 128   ;;  %s921_s8 = smov 8  }
  0x30   : > { %706 = dma.hbm_to_vmem [thread:$0]  (!%p1026_p0), %s1018_s30, 1024, %s1022_s4, %s145_s6, %s920_s7, %s920_s7, %s921_s8  }
  0x31   : > { %p188_p9 = scmp.lt.s32.totalorder %s917_s14, 3  ;;  %s1068_s18 = scalar_lea.hbm %s1416_s1, %s694_s27 }
  0x32   : > { %p1425_p11 = scmp.ge.s32.totalorder %s917_s14, 1  ;;  %s171_s20 = scalar_lea.vmem [#allocation5], %s623_s26 }
  0x33   : > { %s180_s28 = sshll.u32 %s171_s20, 4  ;;  %s168_s30 = scalar_lea.sflag [#allocation6], %s1009_s25  ;;  %s1078_s28 = int_to_ptr.vmem [resolvable:$true] %s180_s28 }
  0x34   : > { %p1072_p12 = pnand %p1425_p11, %p188_p9  ;;  %s801_s4 = scalar_lea.hbm %s1068_s18, 1024 }
  0x35   : > { %p802_p1 = scmp.ne.s32.totalorder %s1068_s18, %s801_s4  ;;  %s806_s29 = scalar_lea.hbm %s1416_s1, 2048 }
  0x36   : > { %p807_p2 = scmp.lt.u32.totalorder %s1068_s18, %s1416_s1  ;;  %p808_p5 = scmp.lt.u32.totalorder %s806_s29, %s801_s4 }
  0x37   : > { %p804_p6 = pnand %p802_p1, %p773_p3  ;;  %p810_p7 = scmp.lt.u32.totalorder %s801_s4, %s1068_s18 }
  0x38   : > { %p809_p4 = por %p808_p5, %p807_p2 }
  0x39   : > { %p805_p13 = pneg %p804_p6 }
  0x3a   : > { %p811_p10 = por %p810_p7, %p809_p4 }
  0x3c   : > { %p812_p9 = pnand %p811_p10, %p805_p13 }
  0x3e   : > { %815 = shalt.err (!%p812_p9)
}
  0x3f   : > { %s816_s26 = scalar_lea.vmem %s1078_s28, 1024  ;;  %s922_s16 = smov [#allocation5]  }
  0x40   : > { %p817_p11 = scmp.ne.s32.totalorder %s1078_s28, %s816_s26  ;;  %s821_s20 = sshll.u32 %s922_s16, 4  ;;  %s822_s20 = int_to_ptr.vmem [resolvable:$false] %s821_s20 }
  0x41   : > { %s823_s27 = scalar_lea.vmem %s822_s20, 2048  ;;  %p824_p8 = scmp.lt.s32.totalorder %s1078_s28, %s822_s20 }
  0x42   : > { %p819_p1 = pnand %p817_p11, %p773_p3  ;;  %p825_p2 = scmp.lt.s32.totalorder %s823_s27, %s816_s26 }
  0x44   : > { %p820_p6 = pneg %p819_p1  ;;  %p826_p5 = por %p825_p2, %p824_p8 }
  0x46   : > { %p827_p4 = pnand %p826_p5, %p820_p6 }
  0x48   : > { %830 = shalt.err (!%p827_p4)
}
  0x49   : > { %709 = dma.hbm_to_vmem [thread:$0]  (!%p1026_p0), %s1068_s18, 1024, %s1078_s28, %s168_s30, %s920_s7, %s920_s7, %s921_s8  }
  0x4a   : > { %192 = sbr.rel (%p1072_p12) target bundleno = 262 (0x106), region = 28  ;;  %s1112_s4 = sand.u32 (!%p1072_p12), 1, %s901_s10  }
  0x4b   : > { %s630_s6 = sshll.u32 (!%p1072_p12), %s1112_s4, 6  ;;  %s195_s29 = scalar_lea.sflag (!%p1072_p12), [#allocation3], %s1112_s4 }
  0x4c   : > { %s1116_s5 = scalar_lea.vmem (!%p1072_p12), [#allocation2], %s630_s6  ;;  %p1427_p8 = scmp.ne.s32.totalorder (!%p1072_p12), %s1421_s21, 0 }
  0x51   : > { %884 = dma.done.wait (%p1427_p8), %s195_s29, 1024  }
  0x52   : > { %886 = vsyncadd (%p1427_p8), %s195_s29, 4294966272  ;;  %s204_s25 = scalar_lea.sflag [#allocation6], %s1112_s4  ;;  %s207_s7 = scalar_lea.vmem [#allocation5], %s630_s6 }
  0x53   : > { %888 = dma.done.wait (%p1427_p8), %s204_s25, 1024  }
  0x54   : > { %890 = vsyncadd (%p1427_p8), %s204_s25, 4294966272  ;;  %v254_v0 = vlaneseq  ;;  %s632_s8 = sshll.u32 %s1112_s4, 9  ;;  %v1130_v2 = vld [vmem:[%s207_s7 + $0x10] sm:$0xff]  ;;  %v1132_v3 = vld [vmem:[%s207_s7] sm:$0xff]  ;;  %s923_s18 = smov 1  }
  0x55   : > { %v1134_v4 = vld [vmem:[%s207_s7 + $0x18] sm:$0xff]  ;;  %339 = vrot.lane.b32.xlu1 %v1130_v2, %s923_s18  ;;  %s1138_s19 = scalar_lea.vmem [#allocation7], %s632_s8  ;;  %335 = vrot.lane.b32.xlu0 %v1132_v3, %s923_s18  ;;  %v1148_v5 = vld [vmem:[%s207_s7 + $0x8] sm:$0xff]  ;;  %s924_s21 = smov 2  }
  0x56   : > { %v1128_v1 = vand.u32 127, %v254_v0  ;;  %635 = vst [vmem:[%s1138_s19 + $0x140] sm:$0xff] %v1130_v2  ;;  %633 = vst [vmem:[%s1138_s19 + $0x100] sm:$0xff] %v1132_v3  ;;  %v1150_v6 = vld [vmem:[%s207_s7 + $0x28] sm:$0xff]  ;;  %v1156_v7 = vld [vmem:[%s207_s7 + $0x20] sm:$0xff]  ;;  %s925_s28 = smov 3  }
  0x57   : > { %636 = vst [vmem:[%s1138_s19 + $0x148] sm:$0xff] %v1134_v4  ;;  %634 = vst [vmem:[%s1138_s19 + $0x108] sm:$0xff] %v1148_v5  ;;  %v1158_v8 = vld [vmem:[%s207_s7 + $0x38] sm:$0xff]  ;;  %v1160_v9 = vld [vmem:[%s207_s7 + $0x30] sm:$0xff]  ;;  %s696_s30 = sshll.u32 %s909_s12, 13  ;;  %s501_s3 = sshll.u32 %s1138_s19, 4  ;;  %s1360_s3 = int_to_ptr.vmem [resolvable:$true] %s501_s3 }
  0x58   : > { %638 = vst [vmem:[%s1138_s19 + $0x188] sm:$0xff] %v1150_v6  ;;  %637 = vst [vmem:[%s1138_s19 + $0x180] sm:$0xff] %v1156_v7  ;;  %vm313_vm0 = vcmp.ge.s32.totalorder %v1128_v1, 1  ;;  %v238_v10 = vld [vmem:[%s1116_s5] sm:$0xff]  ;;  %v239_v11 = vld [vmem:[%s1116_s5 + $0x8] sm:$0xff]  ;;  %vm370_vm1 = vcmp.ge.s32.totalorder %v1128_v1, 2  ;;  %s1358_s16 = scalar_lea.hbm %s1417_s2, %s696_s30 }
  0x59   : > { %640 = vst [vmem:[%s1138_s19 + $0x1c8] sm:$0xff] %v1158_v8  ;;  %639 = vst [vmem:[%s1138_s19 + $0x1c0] sm:$0xff] %v1160_v9  ;;  %v240_v12 = vld [vmem:[%s1116_s5 + $0x10] sm:$0xff]  ;;  %v241_v13 = vld [vmem:[%s1116_s5 + $0x18] sm:$0xff]  ;;  %v316_v16 = vsel %vm313_vm0, %v238_v10, 0.0  ;;  %v317_v17 = vsel %vm313_vm0, %v239_v11, 0.0 }
  0x5a   : > { %v242_v14 = vld [vmem:[%s1116_s5 + $0x20] sm:$0xff]  ;;  %v243_v15 = vld [vmem:[%s1116_s5 + $0x28] sm:$0xff]  ;;  %268 = vst [vmem:[%s1138_s19] sm:$0xff] %v238_v10  ;;  %269 = vst [vmem:[%s1138_s19 + $0x8] sm:$0xff] %v239_v11  ;;  %v318_v18 = vsel %vm313_vm0, %v240_v12, 0.0  ;;  %v319_v21 = vsel %vm313_vm0, %v241_v13, 0.0  ;;  %v373_v24 = vsel %vm370_vm1, %v238_v10, 0.0 }
  0x5b   : > { %270 = vst [vmem:[%s1138_s19 + $0x40] sm:$0xff] %v240_v12  ;;  %341 = vrot.lane.b32.xlu1 %v1134_v4, %s923_s18  ;;  %337 = vrot.lane.b32.xlu0 %v1148_v5, %s923_s18  ;;  %v244_v19 = vld [vmem:[%s1116_s5 + $0x30] sm:$0xff]  ;;  %v320_v22 = vsel %vm313_vm0, %v242_v14, 0.0  ;;  %v321_v23 = vsel %vm313_vm0, %v243_v15, 0.0  ;;  %v374_v27 = vsel %vm370_vm1, %v239_v11, 0.0  ;;  %v375_v28 = vsel %vm370_vm1, %v240_v12, 0.0 }
  0x5c   : > { %v245_v20 = vld [vmem:[%s1116_s5 + $0x38] sm:$0xff]  ;;  %271 = vst [vmem:[%s1138_s19 + $0x48] sm:$0xff] %v241_v13  ;;  %272 = vst [vmem:[%s1138_s19 + $0x80] sm:$0xff] %v242_v14  ;;  %v322_v25 = vsel %vm313_vm0, %v244_v19, 0.0  ;;  %v376_v29 = vsel %vm370_vm1, %v241_v13, 0.0  ;;  %v377_v30 = vsel %vm370_vm1, %v242_v14, 0.0 }
  0x5d   : > { %273 = vst [vmem:[%s1138_s19 + $0x88] sm:$0xff] %v243_v15  ;;  %641 = vst [vmem:[%s1138_s19 + $0x10] sm:$0xff] %v316_v16  ;;  %v323_v26 = vsel %vm313_vm0, %v245_v20, 0.0  ;;  %v378_v31 = vsel %vm370_vm1, %v243_v15, 0.0  ;;  %v379_v32 = vsel %vm370_vm1, %v244_v19, 0.0  ;;  %v380_v33 = vsel %vm370_vm1, %v245_v20, 0.0 }
  0x5e   : > { %642 = vst [vmem:[%s1138_s19 + $0x18] sm:$0xff] %v317_v17  ;;  %643 = vst [vmem:[%s1138_s19 + $0x50] sm:$0xff] %v318_v18  ;;  %vm427_vm2 = vcmp.ge.s32.totalorder %v1128_v1, 3  ;;  %s483_s12 = scalar_lea.sflag [#allocation4], %s1112_s4  ;;  %s831_s20 = scalar_lea.vmem %s1360_s3, 8192 }
  0x5f   : > { %274 = vst [vmem:[%s1138_s19 + $0xc0] sm:$0xff] %v244_v19  ;;  %275 = vst [vmem:[%s1138_s19 + $0xc8] sm:$0xff] %v245_v20  ;;  %345 = vrot.lane.b32.xlu1 %v1150_v6, %s923_s18  ;;  %343 = vrot.lane.b32.xlu0 %v1156_v7, %s923_s18  ;;  %v430_v34 = vsel %vm427_vm2, %v238_v10, 0.0  ;;  %v431_v35 = vsel %vm427_vm2, %v239_v11, 0.0  ;;  %v432_v36 = vsel %vm427_vm2, %v240_v12, 0.0  ;;  %v433_v37 = vsel %vm427_vm2, %v241_v13, 0.0  ;;  %p832_p0 = scmp.ne.s32.totalorder %s1360_s3, %s831_s20 }
  0x60   : > { %644 = vst [vmem:[%s1138_s19 + $0x58] sm:$0xff] %v319_v21  ;;  %645 = vst [vmem:[%s1138_s19 + $0x90] sm:$0xff] %v320_v22  ;;  %v434_v38 = vsel %vm427_vm2, %v242_v14, 0.0  ;;  %v435_v39 = vsel %vm427_vm2, %v243_v15, 0.0  ;;  %v436_v40 = vsel %vm427_vm2, %v244_v19, 0.0  ;;  %v437_v41 = vsel %vm427_vm2, %v245_v20, 0.0 }
  0x61   : > { %646 = vst [vmem:[%s1138_s19 + $0x98] sm:$0xff] %v321_v23  ;;  %657 = vst [vmem:[%s1138_s19 + $0x20] sm:$0xff] %v373_v24  ;;  %p1428_p3 = scmp.ne.s32.totalorder %s1422_s22, 0  ;;  %s926_s27 = smov [#allocation7]  }
  0x62   : > { %647 = vst [vmem:[%s1138_s19 + $0xd0] sm:$0xff] %v322_v25  ;;  %648 = vst [vmem:[%s1138_s19 + $0xd8] sm:$0xff] %v323_v26  ;;  %s835_s6 = sshll.u32 %s926_s27, 4  ;;  %s836_s6 = int_to_ptr.vmem [resolvable:$false] %s835_s6 }
  0x63   : > { %658 = vst [vmem:[%s1138_s19 + $0x28] sm:$0xff] %v374_v27  ;;  %659 = vst [vmem:[%s1138_s19 + $0x60] sm:$0xff] %v375_v28  ;;  %349 = vrot.lane.b32.xlu1 %v1158_v8, %s923_s18  ;;  %347 = vrot.lane.b32.xlu0 %v1160_v9, %s923_s18  ;;  %p833_p12 = pnand %p832_p0, %p1428_p3  ;;  %s837_s29 = scalar_lea.vmem %s836_s6, 16384 }
  0x64   : > { %660 = vst [vmem:[%s1138_s19 + $0x68] sm:$0xff] %v376_v29  ;;  %661 = vst [vmem:[%s1138_s19 + $0xa0] sm:$0xff] %v377_v30  ;;  %p838_p7 = scmp.lt.s32.totalorder %s1360_s3, %s836_s6  ;;  %p839_p10 = scmp.lt.s32.totalorder %s837_s29, %s831_s20 }
  0x65   : > { %662 = vst [vmem:[%s1138_s19 + $0xa8] sm:$0xff] %v378_v31  ;;  %663 = vst [vmem:[%s1138_s19 + $0xe0] sm:$0xff] %v379_v32  ;;  %p834_p13 = pneg %p833_p12 }
  0x66   : > { %664 = vst [vmem:[%s1138_s19 + $0xe8] sm:$0xff] %v380_v33  ;;  %673 = vst [vmem:[%s1138_s19 + $0x30] sm:$0xff] %v430_v34  ;;  %p840_p9 = por %p839_p10, %p838_p7 }
  0x67   : > { %394 = vrot.lane.b32.xlu1 %v1148_v5, %s924_s21  ;;  %392 = vrot.lane.b32.xlu0 %v1132_v3, %s924_s21  ;;  %674 = vst [vmem:[%s1138_s19 + $0x38] sm:$0xff] %v431_v35  ;;  %675 = vst [vmem:[%s1138_s19 + $0x70] sm:$0xff] %v432_v36 }
  0x68   : > { %676 = vst [vmem:[%s1138_s19 + $0x78] sm:$0xff] %v433_v37  ;;  %677 = vst [vmem:[%s1138_s19 + $0xb0] sm:$0xff] %v434_v38  ;;  %p841_p11 = pnand %p840_p9, %p834_p13 }
  0x69   : > { %678 = vst [vmem:[%s1138_s19 + $0xb8] sm:$0xff] %v435_v39  ;;  %679 = vst [vmem:[%s1138_s19 + $0xf0] sm:$0xff] %v436_v40 }
  0x6a   : > { %680 = vst [vmem:[%s1138_s19 + $0xf8] sm:$0xff] %v437_v41 }
  0x6b   : > { %398 = vrot.lane.b32.xlu1 %v1134_v4, %s924_s21  ;;  %396 = vrot.lane.b32.xlu0 %v1130_v2, %s924_s21 }
  0x6f   : > { %402 = vrot.lane.b32.xlu1 %v1150_v6, %s924_s21  ;;  %400 = vrot.lane.b32.xlu0 %v1156_v7, %s924_s21 }
  0x73   : > { %406 = vrot.lane.b32.xlu1 %v1158_v8, %s924_s21  ;;  %404 = vrot.lane.b32.xlu0 %v1160_v9, %s924_s21 }
  0x77   : > { %451 = vrot.lane.b32.xlu1 %v1148_v5, %s925_s28  ;;  %449 = vrot.lane.b32.xlu0 %v1132_v3, %s925_s28 }
  0x7b   : > { %455 = vrot.lane.b32.xlu1 %v1134_v4, %s925_s28  ;;  %453 = vrot.lane.b32.xlu0 %v1130_v2, %s925_s28 }
  0x7f   : > { %459 = vrot.lane.b32.xlu1 %v1150_v6, %s925_s28  ;;  %457 = vrot.lane.b32.xlu0 %v1156_v7, %s925_s28 }
  0x83   : > { %463 = vrot.lane.b32.xlu1 %v1158_v8, %s925_s28  ;;  %461 = vrot.lane.b32.xlu0 %v1160_v9, %s925_s28 }
  0xc7   : > { %v340_v42 = vpop.permute.xlu1 %339  ;;  %v336_v43 = vpop.permute.xlu0 %335 }
  0xc8   : > { %v353_v44 = vsel %vm313_vm0, %v340_v42, 0.0  ;;  %v351_v45 = vsel %vm313_vm0, %v336_v43, 0.0 }
  0xc9   : > { %651 = vst [vmem:[%s1138_s19 + $0x150] sm:$0xff] %v353_v44  ;;  %649 = vst [vmem:[%s1138_s19 + $0x110] sm:$0xff] %v351_v45 }
  0xcd   : > { %v342_v46 = vpop.permute.xlu1 %341  ;;  %v338_v47 = vpop.permute.xlu0 %337 }
  0xce   : > { %v354_v48 = vsel %vm313_vm0, %v342_v46, 0.0  ;;  %v352_v49 = vsel %vm313_vm0, %v338_v47, 0.0 }
  0xcf   : > { %652 = vst [vmem:[%s1138_s19 + $0x158] sm:$0xff] %v354_v48  ;;  %650 = vst [vmem:[%s1138_s19 + $0x118] sm:$0xff] %v352_v49 }
  0xd1   : > { %v346_v50 = vpop.permute.xlu1 %345  ;;  %v344_v51 = vpop.permute.xlu0 %343 }
  0xd2   : > { %v356_v52 = vsel %vm313_vm0, %v346_v50, 0.0  ;;  %v355_v53 = vsel %vm313_vm0, %v344_v51, 0.0 }
  0xd3   : > { %654 = vst [vmem:[%s1138_s19 + $0x198] sm:$0xff] %v356_v52  ;;  %653 = vst [vmem:[%s1138_s19 + $0x190] sm:$0xff] %v355_v53 }
  0xd5   : > { %v350_v54 = vpop.permute.xlu1 %349  ;;  %v348_v55 = vpop.permute.xlu0 %347 }
  0xd6   : > { %v358_v56 = vsel %vm313_vm0, %v350_v54, 0.0  ;;  %v357_v57 = vsel %vm313_vm0, %v348_v55, 0.0 }
  0xd7   : > { %656 = vst [vmem:[%s1138_s19 + $0x1d8] sm:$0xff] %v358_v56  ;;  %655 = vst [vmem:[%s1138_s19 + $0x1d0] sm:$0xff] %v357_v57 }
  0xd9   : > { %v395_v58 = vpop.permute.xlu1 %394  ;;  %v393_v59 = vpop.permute.xlu0 %392 }
  0xda   : > { %v409_v60 = vsel %vm370_vm1, %v395_v58, 0.0  ;;  %v408_v61 = vsel %vm370_vm1, %v393_v59, 0.0 }
  0xdb   : > { %666 = vst [vmem:[%s1138_s19 + $0x128] sm:$0xff] %v409_v60  ;;  %665 = vst [vmem:[%s1138_s19 + $0x120] sm:$0xff] %v408_v61 }
  0xdd   : > { %v399_v62 = vpop.permute.xlu1 %398  ;;  %v397_v63 = vpop.permute.xlu0 %396 }
  0xde   : > { %v411_v0 = vsel %vm370_vm1, %v399_v62, 0.0  ;;  %v410_v2 = vsel %vm370_vm1, %v397_v63, 0.0 }
  0xdf   : > { %668 = vst [vmem:[%s1138_s19 + $0x168] sm:$0xff] %v411_v0  ;;  %667 = vst [vmem:[%s1138_s19 + $0x160] sm:$0xff] %v410_v2 }
  0xe1   : > { %v403_v3 = vpop.permute.xlu1 %402  ;;  %v401_v4 = vpop.permute.xlu0 %400 }
  0xe2   : > { %v413_v5 = vsel %vm370_vm1, %v403_v3, 0.0  ;;  %v412_v6 = vsel %vm370_vm1, %v401_v4, 0.0 }
  0xe3   : > { %670 = vst [vmem:[%s1138_s19 + $0x1a8] sm:$0xff] %v413_v5  ;;  %669 = vst [vmem:[%s1138_s19 + $0x1a0] sm:$0xff] %v412_v6 }
  0xe5   : > { %v407_v7 = vpop.permute.xlu1 %406  ;;  %v405_v8 = vpop.permute.xlu0 %404 }
  0xe6   : > { %v415_v9 = vsel %vm370_vm1, %v407_v7, 0.0  ;;  %v414_v10 = vsel %vm370_vm1, %v405_v8, 0.0 }
  0xe7   : > { %672 = vst [vmem:[%s1138_s19 + $0x1e8] sm:$0xff] %v415_v9  ;;  %671 = vst [vmem:[%s1138_s19 + $0x1e0] sm:$0xff] %v414_v10 }
  0xe9   : > { %v452_v11 = vpop.permute.xlu1 %451  ;;  %v450_v12 = vpop.permute.xlu0 %449 }
  0xea   : > { %v466_v13 = vsel %vm427_vm2, %v452_v11, 0.0  ;;  %v465_v14 = vsel %vm427_vm2, %v450_v12, 0.0 }
  0xeb   : > { %682 = vst [vmem:[%s1138_s19 + $0x138] sm:$0xff] %v466_v13  ;;  %681 = vst [vmem:[%s1138_s19 + $0x130] sm:$0xff] %v465_v14 }
  0xed   : > { %v456_v15 = vpop.permute.xlu1 %455  ;;  %v454_v16 = vpop.permute.xlu0 %453 }
  0xee   : > { %v468_v17 = vsel %vm427_vm2, %v456_v15, 0.0  ;;  %v467_v18 = vsel %vm427_vm2, %v454_v16, 0.0 }
  0xef   : > { %684 = vst [vmem:[%s1138_s19 + $0x178] sm:$0xff] %v468_v17  ;;  %683 = vst [vmem:[%s1138_s19 + $0x170] sm:$0xff] %v467_v18 }
  0xf1   : > { %v460_v19 = vpop.permute.xlu1 %459  ;;  %v458_v20 = vpop.permute.xlu0 %457 }
  0xf2   : > { %v470_v21 = vsel %vm427_vm2, %v460_v19, 0.0  ;;  %v469_v22 = vsel %vm427_vm2, %v458_v20, 0.0 }
  0xf3   : > { %686 = vst [vmem:[%s1138_s19 + $0x1b8] sm:$0xff] %v470_v21  ;;  %685 = vst [vmem:[%s1138_s19 + $0x1b0] sm:$0xff] %v469_v22 }
  0xf5   : > { %v464_v23 = vpop.permute.xlu1 %463  ;;  %v462_v24 = vpop.permute.xlu0 %461 }
  0xf6   : > { %v472_v25 = vsel %vm427_vm2, %v464_v23, 0.0  ;;  %v471_v26 = vsel %vm427_vm2, %v462_v24, 0.0 }
  0xf7   : > { %688 = vst [vmem:[%s1138_s19 + $0x1f8] sm:$0xff] %v472_v25  ;;  %687 = vst [vmem:[%s1138_s19 + $0x1f0] sm:$0xff] %v471_v26 }
  0xf8   : > { %844 = shalt.err (!%p841_p11)
}
  0xf9   : > { %s845_s5 = scalar_lea.hbm %s1358_s16, 8192  ;;  %s849_s8 = scalar_lea.hbm %s1417_s2, 16384 }
  0xfa   : > { %p846_p1 = scmp.ne.s32.totalorder %s1358_s16, %s845_s5  ;;  %p850_p5 = scmp.lt.u32.totalorder %s1358_s16, %s1417_s2 }
  0xfb   : > { %p851_p4 = scmp.lt.u32.totalorder %s849_s8, %s845_s5  ;;  %p853_p0 = scmp.lt.u32.totalorder %s845_s5, %s1358_s16 }
  0xfc   : > { %p847_p6 = pnand %p846_p1, %p1428_p3 }
  0xfd   : > { %p852_p8 = por %p851_p4, %p850_p5 }
  0xfe   : > { %p848_p2 = pneg %p847_p6 }
  0xff   : > { %p854_p12 = por %p853_p0, %p852_p8 }
 0x101   : > { %p855_p13 = pnand %p854_p12, %p848_p2 }
 0x103   : > { %858 = shalt.err (!%p855_p13)
}
 0x104   : > { %s927_s21 = smov 128   ;;  %s928_s28 = smov 8  }
 0x105   : > { %701 = dma.vmem_to_hbm [thread:$0]  (%p1428_p3), %s1360_s3, 8192, %s1358_s16, %s483_s12, %s927_s21, %s927_s21, %s928_s28  }
 0x106 PF: > { %s516_s30 = sand.u32 1, %s897_s9   ;;  %p1429_p7 = scmp.ne.s32.totalorder %s1423_s24, 0 }
 0x107   : > { %p1430_p10 = scmp.ge.s32.totalorder %s917_s14, 2  ;;  %s517_s15 = scalar_lea.sflag [#allocation4], %s516_s30 }
 0x109   : > { %p711_p9 = pnand %p1430_p10, %p1429_p7 }
 0x10b   : > { %892 = dma.done.wait (!%p711_p9), %s517_s15, 8192  }
 0x10c   : > { %894 = vsyncadd (!%p711_p9), %s517_s15, 4294959104  ;;  %s21_s14 = sadd.s32 1, %s917_s14   ;;  %s1431_s9 = smov %s901_s10 }
 0x10d   : > { %p18_p11 = scmp.ge.s32.totalorder %s21_s14, 4   ;;  %s1432_s10 = smov %s905_s11 }
 0x10e   : > { %s1433_s11 = smov %s1000_s23  ;;  %s1434_s12 = smov %s913_s13 }
 0x10f   : > { %s1435_s13 = smov %s1437_s17  ;;  %20 = sbr.rel (!%p18_p11) target bundleno = 8 (0x8), region = 93 }
 0x116   :  { %522 = vsyncpa [#allocation3], 1 }
 0x117   :  { %524 = vsyncpa [#allocation3 + $0x1], 1 }
 0x118   :  { %525 = vsyncpa [#allocation6], 1 }
 0x119   :  { %527 = vsyncpa [#allocation6 + $0x1], 1 }
 0x11a   :  { %528 = vsyncpa [#allocation4], 1 }
 0x11b   :  { %530 = vsyncpa [#allocation4 + $0x1], 1 }

</bundles_post_ra>
